<compile_context>
chip_gen: v7x
topology: tpu7x:2x2x1
jax: 0.10.0
libtpu: 0.0.40
codegen_flags: <defaults>
</compile_context>

<pallas_src>
import numpy as np
import jax
import jax.numpy as jnp
from jax.experimental import pallas as pl
from jax.experimental.pallas import tpu as pltpu


def _se3d_fused_kernel(x_ref, w1c_ref, w2c_ref, a2_ref, w2he_ref, a3_ref,
                       w2we_ref, o_ref):
    """Fused 3-step squeeze-excitation on a (BT, C, HW) slab."""
    f32 = jnp.float32
    x = x_ref[...].astype(f32)                                        # (BT, C, HW)

    # ---- step 1: modulate C (squeeze over H, W) ------------------------------
    m1 = jnp.mean(x, axis=2)                                          # (BT, C)
    h1 = jnp.maximum(
        jnp.dot(m1, w1c_ref[...], preferred_element_type=f32), 0.0)   # (BT, G1)
    s1 = jnp.dot(h1, w2c_ref[...], preferred_element_type=f32)        # (BT, C)
    # Double sigmoid is intentional (matches the PyTorch module exactly).
    f1 = 1.0 + jax.nn.sigmoid(jax.nn.sigmoid(s1))                     # (BT, C)

    x1 = x * f1[:, :, None]                                           # (BT, C, HW): x after step 1
    y = jnp.sum(x1, axis=1)                                           # (BT, HW): per-column sums

    # ---- step 2: modulate H (squeeze over C, W) ------------------------------
    # a2 folds {group lanes by h, mean over (C, W)} @ W1_h^T            (HW, G2)
    h2 = jnp.maximum(
        jnp.dot(y, a2_ref[...], preferred_element_type=f32), 0.0)     # (BT, G2)
    # w2he folds W2_h^T followed by the per-h -> per-(h,w) lane expansion.
    e2 = 1.0 + jax.nn.sigmoid(jax.nn.sigmoid(
        jnp.dot(h2, w2he_ref[...], preferred_element_type=f32)))      # (BT, HW)

    # ---- step 3: modulate W (squeeze over C, H) ------------------------------
    h3 = jnp.maximum(
        jnp.dot(y * e2, a3_ref[...], preferred_element_type=f32), 0.0)  # (BT, G3)
    e3 = 1.0 + jax.nn.sigmoid(jax.nn.sigmoid(
        jnp.dot(h3, w2we_ref[...], preferred_element_type=f32)))      # (BT, HW)

    # ---- fused scale + lane-dense store: out = x * f1 * f2 * f3 --------------
    o_ref[...] = (x1 * (e2 * e3)[:, None, :]).astype(o_ref.dtype)


def _pick_block_batch(B, slab_bytes, budget=1 << 20):
    """Largest divisor of B whose block fits `budget`; keep >=2 grid steps when
    B > 1 so the input/output DMAs pipeline with compute."""
    max_bt = max(1, min(B, budget // max(slab_bytes, 1)))
    if B > 1:
        max_bt = min(max_bt, max(1, B // 2))
    bt = 1
    for d in range(1, max_bt + 1):
        if B % d == 0:
            bt = d
    return bt


@jax.jit
def se3d_pallas(x, params):
    """x: (B, C, H, W). params[d] = (W1, W2) in PyTorch (out, in) orientation:
    for modulated feature F in (C, H, W): W1 (F//r, F), W2 (F, F//r)."""
    B, C, H, W = x.shape
    HW = H * W
    f32 = jnp.float32
    (w1c, w2c), (w1h, w2h), (w1w, w2w) = params

    row_h = np.arange(HW) // W            # lane index -> h
    col_w = np.arange(HW) % W             # lane index -> w

    # Fold the group-means and the per-h / per-w lane expansion into the MLP weights.
    # Pure gathers on tiny matrices -> exact, done once per call outside the kernel.
    a2 = jnp.asarray(w1h, f32)[:, row_h].T / (C * W)     # (HW, G2)
    w2h_e = jnp.asarray(w2h, f32).T[:, row_h]            # (G2, HW)
    a3 = jnp.asarray(w1w, f32)[:, col_w].T / (C * H)     # (HW, G3)
    w2w_e = jnp.asarray(w2w, f32).T[:, col_w]            # (G3, HW)
    w1c_t = jnp.asarray(w1c, f32).T                      # (C, G1)
    w2c_t = jnp.asarray(w2c, f32).T                      # (G1, C)

    x_flat = x.reshape(B, C, HW)          # free: memory layout unchanged (no transpose)

    slab_bytes = C * HW * x.dtype.itemsize
    bt = _pick_block_batch(B, slab_bytes)
    block_bytes = bt * slab_bytes
    const_bytes = sum(int(np.prod(a.shape)) * 4
                      for a in (w1c_t, w2c_t, a2, w2h_e, a3, w2w_e))
    work_bytes = 2 * bt * C * HW * 4      # f32 working copies (x, x1)
    vmem_limit = int(min(max(4 * block_bytes + const_bytes + work_bytes + (2 << 20),
                             16 << 20),
                         32 << 20))       # explicit + capped for v7x's smaller VMEM

    vmem = pltpu.MemorySpace.VMEM
    out_flat = pl.pallas_call(
        _se3d_fused_kernel,
        out_shape=jax.ShapeDtypeStruct((B, C, HW), x.dtype),
        grid=(B // bt,),
        in_specs=[
            pl.BlockSpec((bt, C, HW), lambda b: (b, 0, 0)),  # x slab (pipelined)
            pl.BlockSpec(memory_space=vmem),                 # w1c^T
            pl.BlockSpec(memory_space=vmem),                 # w2c^T
            pl.BlockSpec(memory_space=vmem),                 # a2
            pl.BlockSpec(memory_space=vmem),                 # w2h_e
            pl.BlockSpec(memory_space=vmem),                 # a3
            pl.BlockSpec(memory_space=vmem),                 # w2w_e
        ],
        out_specs=pl.BlockSpec((bt, C, HW), lambda b: (b, 0, 0)),
        compiler_params=pltpu.CompilerParams(
            dimension_semantics=("parallel",),
            vmem_limit_bytes=vmem_limit,
        ),
        # TODO(synk): input_output_aliases={0: 0} would update x in place (saves one
        # HBM buffer), skipped here so the demo can reuse x for the reference check.
    )(x_flat, w1c_t, w2c_t, a2, w2h_e, a3, w2w_e)

    return out_flat.reshape(B, C, H, W)


def se3d_reference(x, params):
    """Pure-JAX reference matching the PyTorch forward exactly (incl. double sigmoid)."""
    hp = jax.lax.Precision.HIGHEST
    for dim in (1, 2, 3):
        axes = tuple(i for i in range(1, 4) if i != dim)
        a = jnp.mean(x, axis=axes)                           # (B, F)
        w1, w2 = params[dim - 1]                             # (G, F), (F, G)
        h = jnp.maximum(jnp.dot(a, w1.T, precision=hp), 0.0)
        s = jnp.dot(h, w2.T, precision=hp)
        w = jax.nn.sigmoid(jax.nn.sigmoid(s))
        shape = [x.shape[0], 1, 1, 1]
        shape[dim] = x.shape[dim]
        x = x + w.reshape(shape) * x
    return x


def make_params(feat_size, ratio, key):
    """Deterministic synthetic weights in PyTorch nn.Linear (out, in) orientation."""
    keys = jax.random.split(key, 2 * len(feat_size))
    params = []
    for i, f in enumerate(feat_size):
        g = max(f // ratio, 1)
        w1 = jax.random.normal(keys[2 * i], (g, f), jnp.float32) / jnp.sqrt(f)
        w2 = jax.random.normal(keys[2 * i + 1], (f, g), jnp.float32) / jnp.sqrt(g)
        params.append((w1, w2))
    return params


if __name__ == "__main__":
    B, C, H, W = 2, 8, 16, 16
    ratio = 4

    key = jax.random.PRNGKey(0)
    kx, kp = jax.random.split(key)
    x = jax.random.normal(kx, (B, C, H, W), jnp.float32)
    params = make_params([C, H, W], ratio, kp)

    out = jax.block_until_ready(se3d_pallas(x, params))
    ref = se3d_reference(x, params)

    # Tolerance allows for f32 matmuls with different (folded) association order.
    if not jnp.allclose(out, ref, atol=1e-3, rtol=1e-3):
        max_err = float(jnp.max(jnp.abs(out - ref)))
        raise AssertionError(
            f"Pallas SE3DBlock output mismatch (max abs err {max_err:.3e})")
    print("KERNEL_OK")
</pallas_src>

<mosaic_0001>
module attributes {stable_mosaic.version = 11 : i64} {
  func.func @_se3d_fused_kernel(%arg0: i32, %arg1: memref<1x8x256xf32, #tpu.memory_space<vmem>>, %arg2: memref<8x2xf32, #tpu.memory_space<vmem>>, %arg3: memref<2x8xf32, #tpu.memory_space<vmem>>, %arg4: memref<256x4xf32, #tpu.memory_space<vmem>>, %arg5: memref<4x256xf32, #tpu.memory_space<vmem>>, %arg6: memref<256x4xf32, #tpu.memory_space<vmem>>, %arg7: memref<4x256xf32, #tpu.memory_space<vmem>>, %arg8: memref<1x8x256xf32, #tpu.memory_space<vmem>>) attributes {dimension_semantics = [#tpu.dimension_semantics<parallel>], iteration_bounds = array<i64: 2>, scalar_prefetch = 0 : i64, scratch_operands = 0 : i64, tpu.core_type = #tpu.core_type<tc>, window_params = [{transform_indices = @transform_0, window_bounds = array<i64: 1, 8, 256>}, {pipeline_mode = #tpu.pipeline_mode<synchronous>, transform_indices = @transform_1, window_bounds = array<i64: 8, 2>}, {pipeline_mode = #tpu.pipeline_mode<synchronous>, transform_indices = @transform_2, window_bounds = array<i64: 2, 8>}, {pipeline_mode = #tpu.pipeline_mode<synchronous>, transform_indices = @transform_3, window_bounds = array<i64: 256, 4>}, {pipeline_mode = #tpu.pipeline_mode<synchronous>, transform_indices = @transform_4, window_bounds = array<i64: 4, 256>}, {pipeline_mode = #tpu.pipeline_mode<synchronous>, transform_indices = @transform_5, window_bounds = array<i64: 256, 4>}, {pipeline_mode = #tpu.pipeline_mode<synchronous>, transform_indices = @transform_6, window_bounds = array<i64: 4, 256>}, {transform_indices = @transform_7, window_bounds = array<i64: 1, 8, 256>}]} {
    %c0 = arith.constant 0 : index
    %c0_0 = arith.constant 0 : index
    %c0_1 = arith.constant 0 : index
    %0 = vector.load %arg1[%c0, %c0_0, %c0_1] : memref<1x8x256xf32, #tpu.memory_space<vmem>>, vector<1x8x256xf32>
    %cst = arith.constant dense<0.000000e+00> : vector<1x8xf32>
    %1 = vector.multi_reduction <add>, %0, %cst [2] : vector<1x8x256xf32> to vector<1x8xf32>
    %cst_2 = arith.constant 2.560000e+02 : f32
    %2 = vector.broadcast %cst_2 : f32 to vector<1x8xf32>
    %3 = arith.divf %1, %2 : vector<1x8xf32>
    %c0_3 = arith.constant 0 : index
    %c0_4 = arith.constant 0 : index
    %4 = vector.load %arg2[%c0_3, %c0_4] : memref<8x2xf32, #tpu.memory_space<vmem>>, vector<8x2xf32>
    %cst_5 = arith.constant dense<0.000000e+00> : vector<1x2xf32>
    %5 = tpu.matmul %3, %4, %cst_5 {dimension_numbers = #tpu.dot_dimension_numbers<[1], [0], [0], [1], [0, 0, 1, 1], [], []>} : vector<1x8xf32>, vector<8x2xf32>, vector<1x2xf32> -> vector<1x2xf32>
    %cst_6 = arith.constant 0.000000e+00 : f32
    %6 = vector.broadcast %cst_6 : f32 to vector<1x2xf32>
    %7 = arith.maximumf %5, %6 : vector<1x2xf32>
    %c0_7 = arith.constant 0 : index
    %c0_8 = arith.constant 0 : index
    %8 = vector.load %arg3[%c0_7, %c0_8] : memref<2x8xf32, #tpu.memory_space<vmem>>, vector<2x8xf32>
    %cst_9 = arith.constant dense<0.000000e+00> : vector<1x8xf32>
    %9 = tpu.matmul %7, %8, %cst_9 {dimension_numbers = #tpu.dot_dimension_numbers<[1], [0], [0], [1], [0, 0, 1, 1], [], []>} : vector<1x2xf32>, vector<2x8xf32>, vector<1x8xf32> -> vector<1x8xf32>
    %10 = arith.negf %9 : vector<1x8xf32>
    %11 = math.exp %10 : vector<1x8xf32>
    %cst_10 = arith.constant 1.000000e+00 : f32
    %12 = vector.broadcast %cst_10 : f32 to vector<1x8xf32>
    %13 = arith.addf %12, %11 : vector<1x8xf32>
    %14 = arith.divf %12, %13 : vector<1x8xf32>
    %15 = arith.negf %14 : vector<1x8xf32>
    %16 = math.exp %15 : vector<1x8xf32>
    %cst_11 = arith.constant 1.000000e+00 : f32
    %17 = vector.broadcast %cst_11 : f32 to vector<1x8xf32>
    %18 = arith.addf %17, %16 : vector<1x8xf32>
    %19 = arith.divf %17, %18 : vector<1x8xf32>
    %cst_12 = arith.constant 1.000000e+00 : f32
    %20 = vector.broadcast %cst_12 : f32 to vector<1x8xf32>
    %21 = arith.addf %20, %19 : vector<1x8xf32>
    %22 = vector.shape_cast %21 : vector<1x8xf32> to vector<1x8x1xf32>
    %23 = vector.broadcast %22 : vector<1x8x1xf32> to vector<1x8x256xf32>
    %24 = arith.mulf %0, %23 : vector<1x8x256xf32>
    %cst_13 = arith.constant dense<0.000000e+00> : vector<1x256xf32>
    %25 = vector.multi_reduction <add>, %24, %cst_13 [1] : vector<1x8x256xf32> to vector<1x256xf32>
    %c0_14 = arith.constant 0 : index
    %c0_15 = arith.constant 0 : index
    %26 = vector.load %arg4[%c0_14, %c0_15] : memref<256x4xf32, #tpu.memory_space<vmem>>, vector<256x4xf32>
    %cst_16 = arith.constant dense<0.000000e+00> : vector<1x4xf32>
    %27 = tpu.matmul %25, %26, %cst_16 {dimension_numbers = #tpu.dot_dimension_numbers<[1], [0], [0], [1], [0, 0, 1, 1], [], []>} : vector<1x256xf32>, vector<256x4xf32>, vector<1x4xf32> -> vector<1x4xf32>
    %cst_17 = arith.constant 0.000000e+00 : f32
    %28 = vector.broadcast %cst_17 : f32 to vector<1x4xf32>
    %29 = arith.maximumf %27, %28 : vector<1x4xf32>
    %c0_18 = arith.constant 0 : index
    %c0_19 = arith.constant 0 : index
    %30 = vector.load %arg5[%c0_18, %c0_19] : memref<4x256xf32, #tpu.memory_space<vmem>>, vector<4x256xf32>
    %cst_20 = arith.constant dense<0.000000e+00> : vector<1x256xf32>
    %31 = tpu.matmul %29, %30, %cst_20 {dimension_numbers = #tpu.dot_dimension_numbers<[1], [0], [0], [1], [0, 0, 1, 1], [], []>} : vector<1x4xf32>, vector<4x256xf32>, vector<1x256xf32> -> vector<1x256xf32>
    %32 = arith.negf %31 : vector<1x256xf32>
    %33 = math.exp %32 : vector<1x256xf32>
    %cst_21 = arith.constant 1.000000e+00 : f32
    %34 = vector.broadcast %cst_21 : f32 to vector<1x256xf32>
    %35 = arith.addf %34, %33 : vector<1x256xf32>
    %36 = arith.divf %34, %35 : vector<1x256xf32>
    %37 = arith.negf %36 : vector<1x256xf32>
    %38 = math.exp %37 : vector<1x256xf32>
    %cst_22 = arith.constant 1.000000e+00 : f32
    %39 = vector.broadcast %cst_22 : f32 to vector<1x256xf32>
    %40 = arith.addf %39, %38 : vector<1x256xf32>
    %41 = arith.divf %39, %40 : vector<1x256xf32>
    %cst_23 = arith.constant 1.000000e+00 : f32
    %42 = vector.broadcast %cst_23 : f32 to vector<1x256xf32>
    %43 = arith.addf %42, %41 : vector<1x256xf32>
    %44 = arith.mulf %25, %43 : vector<1x256xf32>
    %c0_24 = arith.constant 0 : index
    %c0_25 = arith.constant 0 : index
    %45 = vector.load %arg6[%c0_24, %c0_25] : memref<256x4xf32, #tpu.memory_space<vmem>>, vector<256x4xf32>
    %cst_26 = arith.constant dense<0.000000e+00> : vector<1x4xf32>
    %46 = tpu.matmul %44, %45, %cst_26 {dimension_numbers = #tpu.dot_dimension_numbers<[1], [0], [0], [1], [0, 0, 1, 1], [], []>} : vector<1x256xf32>, vector<256x4xf32>, vector<1x4xf32> -> vector<1x4xf32>
    %cst_27 = arith.constant 0.000000e+00 : f32
    %47 = vector.broadcast %cst_27 : f32 to vector<1x4xf32>
    %48 = arith.maximumf %46, %47 : vector<1x4xf32>
    %c0_28 = arith.constant 0 : index
    %c0_29 = arith.constant 0 : index
    %49 = vector.load %arg7[%c0_28, %c0_29] : memref<4x256xf32, #tpu.memory_space<vmem>>, vector<4x256xf32>
    %cst_30 = arith.constant dense<0.000000e+00> : vector<1x256xf32>
    %50 = tpu.matmul %48, %49, %cst_30 {dimension_numbers = #tpu.dot_dimension_numbers<[1], [0], [0], [1], [0, 0, 1, 1], [], []>} : vector<1x4xf32>, vector<4x256xf32>, vector<1x256xf32> -> vector<1x256xf32>
    %51 = arith.negf %50 : vector<1x256xf32>
    %52 = math.exp %51 : vector<1x256xf32>
    %cst_31 = arith.constant 1.000000e+00 : f32
    %53 = vector.broadcast %cst_31 : f32 to vector<1x256xf32>
    %54 = arith.addf %53, %52 : vector<1x256xf32>
    %55 = arith.divf %53, %54 : vector<1x256xf32>
    %56 = arith.negf %55 : vector<1x256xf32>
    %57 = math.exp %56 : vector<1x256xf32>
    %cst_32 = arith.constant 1.000000e+00 : f32
    %58 = vector.broadcast %cst_32 : f32 to vector<1x256xf32>
    %59 = arith.addf %58, %57 : vector<1x256xf32>
    %60 = arith.divf %58, %59 : vector<1x256xf32>
    %cst_33 = arith.constant 1.000000e+00 : f32
    %61 = vector.broadcast %cst_33 : f32 to vector<1x256xf32>
    %62 = arith.addf %61, %60 : vector<1x256xf32>
    %63 = arith.mulf %43, %62 : vector<1x256xf32>
    %64 = vector.shape_cast %63 : vector<1x256xf32> to vector<1x1x256xf32>
    %65 = vector.broadcast %64 : vector<1x1x256xf32> to vector<1x8x256xf32>
    %66 = arith.mulf %24, %65 : vector<1x8x256xf32>
    %c0_34 = arith.constant 0 : index
    %c0_35 = arith.constant 0 : index
    %c0_36 = arith.constant 0 : index
    %67 = vector.load %arg8[%c0_34, %c0_35, %c0_36] : memref<1x8x256xf32, #tpu.memory_space<vmem>>, vector<1x8x256xf32>
    tpu.vector_store %arg8[%c0_34, %c0_35, %c0_36], %66 {strides = array<i32>} : memref<1x8x256xf32, #tpu.memory_space<vmem>>, vector<1x8x256xf32>,
    return
  }
  func.func @transform_0(%arg0: i32) -> (i32, i32, i32) {
    %c0_i32 = arith.constant 0 : i32
    %c0_i32_0 = arith.constant 0 : i32
    %c0_i32_1 = arith.constant 0 : i32
    return %arg0, %c0_i32, %c0_i32_0 : i32, i32, i32
  }
  func.func @transform_1(%arg0: i32) -> (i32, i32) {
    %c0_i32 = arith.constant 0 : i32
    %c0_i32_0 = arith.constant 0 : i32
    %c0_i32_1 = arith.constant 0 : i32
    return %c0_i32, %c0_i32_0 : i32, i32
  }
  func.func @transform_2(%arg0: i32) -> (i32, i32) {
    %c0_i32 = arith.constant 0 : i32
    %c0_i32_0 = arith.constant 0 : i32
    %c0_i32_1 = arith.constant 0 : i32
    return %c0_i32, %c0_i32_0 : i32, i32
  }
  func.func @transform_3(%arg0: i32) -> (i32, i32) {
    %c0_i32 = arith.constant 0 : i32
    %c0_i32_0 = arith.constant 0 : i32
    %c0_i32_1 = arith.constant 0 : i32
    return %c0_i32, %c0_i32_0 : i32, i32
  }
  func.func @transform_4(%arg0: i32) -> (i32, i32) {
    %c0_i32 = arith.constant 0 : i32
    %c0_i32_0 = arith.constant 0 : i32
    %c0_i32_1 = arith.constant 0 : i32
    return %c0_i32, %c0_i32_0 : i32, i32
  }
  func.func @transform_5(%arg0: i32) -> (i32, i32) {
    %c0_i32 = arith.constant 0 : i32
    %c0_i32_0 = arith.constant 0 : i32
    %c0_i32_1 = arith.constant 0 : i32
    return %c0_i32, %c0_i32_0 : i32, i32
  }
  func.func @transform_6(%arg0: i32) -> (i32, i32) {
    %c0_i32 = arith.constant 0 : i32
    %c0_i32_0 = arith.constant 0 : i32
    %c0_i32_1 = arith.constant 0 : i32
    return %c0_i32, %c0_i32_0 : i32, i32
  }
  func.func @transform_7(%arg0: i32) -> (i32, i32, i32) {
    %c0_i32 = arith.constant 0 : i32
    %c0_i32_0 = arith.constant 0 : i32
    %c0_i32_1 = arith.constant 0 : i32
    return %arg0, %c0_i32, %c0_i32_0 : i32, i32, i32
  }
}

</mosaic_0001>

<bundles_post_ra>
// kernel: se3d_pallas.1
= control target key start
LH: loop header
LB: loop body
LE: loop exit
PB: predicated region body
PF: predicated region fallthrough
CT: control target
= control target key end

     0   :  { %s1256_s24 = smov 0   ;;  %s1531_s0 = inlined_call_operand.vmem [shape: f32[2,8,256], index: 0, kind: input, shape index: {}]   ;;  %s1532_s1 = inlined_call_operand.vmem [shape: f32[8,2], index: 1, kind: input, shape index: {}]   ;;  %s1533_s2 = inlined_call_operand.vmem [shape: f32[2,8], index: 2, kind: input, shape index: {}]   ;;  %s1534_s3 = inlined_call_operand.vmem [shape: f32[256,4], index: 3, kind: input, shape index: {}]   ;;  %s1535_s4 = inlined_call_operand.vmem [shape: f32[4,256], index: 4, kind: input, shape index: {}]   ;;  %s1536_s5 = inlined_call_operand.vmem [shape: f32[256,4], index: 5, kind: input, shape index: {}]   ;;  %s1537_s6 = inlined_call_operand.vmem [shape: f32[4,256], index: 6, kind: input, shape index: {}]   ;;  %s1538_s7 = inlined_call_operand.vmem [shape: f32[2,8,256], index: 7, kind: output, shape index: {}]  }
   0x1 LB: > { %s974_s25 = sadd.s32 4294967295, %s1212_s24   ;;  %p978_p0 = scmp.ge.s32.totalorder %s1212_s24, 1  ;;  %s1212_s24 = sphi %s1256_s24, %s17_s24  }
   0x2   : > { %p237_p1 = scmp.lt.s32.totalorder %s1212_s24, 3 }
   0x4   : > { %p238_p2 = pnand %p978_p0, %p237_p1 }
   0x5   : > { %p269_p3 = scmp.lt.s32.totalorder (!%p238_p2), %s974_s25, 1  ;;  %v1214_v3 = vmov (!%p238_p2), 0.0   ;;  %v286_v4 = vld [vmem:[%s1532_s1] sm:$0xff] (!%p238_p2)  ;;  %vm1215_vm0 = vmmov (!%p238_p2), 0   ;;  %v288_v5 = vlaneseq (!%p238_p2)  ;;  %vm294_vm1 = vcmask (!%p238_p2), 64512   ;;  %v498_v17 = vld [vmem:[%s1534_s3 + $0x88] sm:$0xff] (!%p238_p2) }
   0x6   : > { %241 = sbr.rel (%p238_p2) target bundleno = 1755 (0x6db), region = 48  ;;  %1080 = vmatprep.subr.mxu0 (!%p238_p2), %v1214_v3  ;;  %1085 = vmatprep.subr.mxu1 (!%p238_p2), %v1214_v3  ;;  %v368_v12 = vld [vmem:[%s1533_s2] sm:$0x3] (!%p238_p2)  ;;  %vm373_vm2 = vcmask (!%p238_p2), 1041408   ;;  %vm369_vm3 = vcmask (!%p238_p2), 15360   ;;  %v482_v20 = vld [vmem:[%s1534_s3 + $0x8] sm:$0xff] (!%p238_p2) }
   0x7   : > { %1081 = vmatpush3.msra.mxu0 (!%p238_p2), %v286_v4  ;;  %1082 = vmatprep.mubr.msk.f32.mxu0 (!%p238_p2), %vm1215_vm0, %v1214_v3  ;;  %v289_v6 = vand.u32 (!%p238_p2), 127, %v288_v5  ;;  %v1285_v7 = vshrl.u32 (!%p238_p2), %v288_v5, 7  ;;  %v497_v16 = vld [vmem:[%s1534_s3 + $0x80] sm:$0xff] (!%p238_p2)  ;;  %v499_v21 = vld [vmem:[%s1534_s3 + $0x90] sm:$0xff] (!%p238_p2)  ;;  %v500_v22 = vld [vmem:[%s1534_s3 + $0x98] sm:$0xff] (!%p238_p2)  ;;  %vm591_vm4 = vcmask (!%p238_p2), 1043456  }
   0x8   : > { %1087 = vmatprep.mubr.msk.f32.mxu1 (!%p238_p2), %vm1215_vm0, %v1214_v3  ;;  %1086 = vmatpush3.msk.msra.mxu1 (!%p238_p2), %vm373_vm2, %v368_v12  ;;  %v481_v18 = vld [vmem:[%s1534_s3] sm:$0xff] (!%p238_p2)  ;;  %v1090_v19 = vpack.c.bf16 (!%p238_p2), %v498_v17, %v497_v16  ;;  %v1094_v24 = vpack.c.bf16 (!%p238_p2), %v500_v22, %v499_v21  ;;  %v483_v25 = vld [vmem:[%s1534_s3 + $0x10] sm:$0xff] (!%p238_p2)  ;;  %v484_v26 = vld [vmem:[%s1534_s3 + $0x18] sm:$0xff] (!%p238_p2)  ;;  %vm587_vm5 = vcmask (!%p238_p2), 31744  }
   0x9   : > { %v292_v8 = vsub.s32 (!%p238_p2), %v289_v6, %v1285_v7  ;;  %v1092_v23 = vpack.c.bf16 (!%p238_p2), %v482_v20, %v481_v18  ;;  %v501_v27 = vld [vmem:[%s1534_s3 + $0xa0] sm:$0xff] (!%p238_p2)  ;;  %v502_v28 = vld [vmem:[%s1534_s3 + $0xa8] sm:$0xff] (!%p238_p2)  ;;  %v1096_v29 = vpack.c.bf16 (!%p238_p2), %v484_v26, %v483_v25  ;;  %v503_v33 = vld [vmem:[%s1534_s3 + $0xb0] sm:$0xff] (!%p238_p2)  ;;  %v1377_v6 = vsub.s32 (!%p238_p2), 0, %v1285_v7 }
   0xa   : > { %1091 = vmatprep.subr.bf16.mxu0 (!%p238_p2), %v1090_v19  ;;  %v1098_v30 = vpack.c.bf16 (!%p238_p2), %v502_v28, %v501_v27  ;;  %v485_v31 = vld [vmem:[%s1534_s3 + $0x20] sm:$0xff] (!%p238_p2)  ;;  %v486_v32 = vld [vmem:[%s1534_s3 + $0x28] sm:$0xff] (!%p238_p2)  ;;  %v504_v34 = vld [vmem:[%s1534_s3 + $0xb8] sm:$0xff] (!%p238_p2) }
   0xb   : > { %v1100_v35 = vpack.c.bf16 (!%p238_p2), %v486_v32, %v485_v31  ;;  %v1102_v36 = vpack.c.bf16 (!%p238_p2), %v504_v34, %v503_v33  ;;  %v487_v37 = vld [vmem:[%s1534_s3 + $0x30] sm:$0xff] (!%p238_p2)  ;;  %v488_v38 = vld [vmem:[%s1534_s3 + $0x38] sm:$0xff] (!%p238_p2)  ;;  %v505_v39 = vld [vmem:[%s1534_s3 + $0xc0] sm:$0xff] (!%p238_p2) }
   0xc   : > { %v506_v40 = vld [vmem:[%s1534_s3 + $0xc8] sm:$0xff] (!%p238_p2)  ;;  %v1104_v41 = vpack.c.bf16 (!%p238_p2), %v488_v38, %v487_v37  ;;  %v489_v52 = vld [vmem:[%s1534_s3 + $0x40] sm:$0xff] (!%p238_p2)  ;;  %v507_v55 = vld [vmem:[%s1534_s3 + $0xd0] sm:$0xff] (!%p238_p2) }
   0xd   : > { %s1540_s25 = smov (!%p269_p3, %s974_s25), 1  ;;  %v1106_v42 = vpack.c.bf16 %v506_v40, %v505_v39  ;;  %v490_v53 = vld [vmem:[%s1534_s3 + $0x48] sm:$0xff]  ;;  %v508_v56 = vld [vmem:[%s1534_s3 + $0xd8] sm:$0xff]  ;;  %v491_v58 = vld [vmem:[%s1534_s3 + $0x50] sm:$0xff] }
   0xe   : > { %s1004_s26 = sshll.u32 %s1540_s25, 4  ;;  %v1108_v54 = vpack.c.bf16 %v490_v53, %v489_v52  ;;  %v1110_v57 = vpack.c.bf16 %v508_v56, %v507_v55  ;;  %v492_v59 = vld [vmem:[%s1534_s3 + $0x58] sm:$0xff]  ;;  %v509_v61 = vld [vmem:[%s1534_s3 + $0xe0] sm:$0xff]  ;;  %v510_v62 = vld [vmem:[%s1534_s3 + $0xe8] sm:$0xff] }
   0xf   : > { %s273_s29 = scalar_lea.vmem %s1531_s0, %s1004_s26  ;;  %v1112_v60 = vpack.c.bf16 %v492_v59, %v491_v58  ;;  %v1114_v63 = vpack.c.bf16 %v510_v62, %v509_v61  ;;  %v494_v4 = vld [vmem:[%s1534_s3 + $0x68] sm:$0xff]  ;;  %v496_v7 = vld [vmem:[%s1534_s3 + $0x78] sm:$0xff]  ;;  %v695_v37 = vld [vmem:[%s1536_s5] sm:$0xff]  ;;  %s278_s28 = scalar_lea.vmem %s1538_s7, %s1004_s26 }
  0x10   : > { %v1272_v0 = vld [vmem:[%s273_s29] sm:$0xff]  ;;  %v1274_v1 = vld [vmem:[%s273_s29 + $0x8] sm:$0xff]  ;;  %v713_v40 = vld [vmem:[%s1536_s5 + $0x90] sm:$0xff] }
  0x11   : > { %v281_v2 = vadd.f32 %v1274_v1, %v1272_v0  ;;  %v696_v38 = vld [vmem:[%s1536_s5 + $0x8] sm:$0xff]  ;;  %v717_v52 = vld [vmem:[%s1536_s5 + $0xb0] sm:$0xff]  ;;  %v718_v53 = vld [vmem:[%s1536_s5 + $0xb8] sm:$0xff] }
  0x12   : > { %v1124_v39 = vpack.c.bf16 %v696_v38, %v695_v37  ;;  %v701_v55 = vld [vmem:[%s1536_s5 + $0x30] sm:$0xff]  ;;  %v702_v56 = vld [vmem:[%s1536_s5 + $0x38] sm:$0xff]  ;;  %v719_v58 = vld [vmem:[%s1536_s5 + $0xc0] sm:$0xff] }
  0x13   : > { %282 = vadd.xlane.f32.xlu0 %v281_v2  ;;  %v493_v2 = vld [vmem:[%s1534_s3 + $0x60] sm:$0xff]  ;;  %v720_v59 = vld [vmem:[%s1536_s5 + $0xc8] sm:$0xff] }
  0x14   : > { %v1116_v5 = vpack.c.bf16 %v494_v4, %v493_v2  ;;  %v703_v61 = vld [vmem:[%s1536_s5 + $0x40] sm:$0xff]  ;;  %v704_v62 = vld [vmem:[%s1536_s5 + $0x48] sm:$0xff]  ;;  %v721_v2 = vld [vmem:[%s1536_s5 + $0xd0] sm:$0xff] }
  0x15   : > { %v722_v4 = vld [vmem:[%s1536_s5 + $0xd8] sm:$0xff] }
  0xa0   : > { %v283_v9 = vpop.xlane.xlu0 %282 }
  0xa1   : > { %v285_v10 = vmul.f32 0.00390625, %v283_v9  ;;  %v511_v9 = vld [vmem:[%s1534_s3 + $0xf0] sm:$0xff] }
  0xa3   : > { %v293_v11 = vrot.slane %v285_v10, %v292_v8  ;;  %v512_v10 = vld [vmem:[%s1534_s3 + $0xf8] sm:$0xff] }
  0xa4   : > { %v1118_v12 = vpack.c.bf16 %v512_v10, %v511_v9  ;;  %v706_v9 = vld [vmem:[%s1536_s5 + $0x58] sm:$0xff]  ;;  %v723_v10 = vld [vmem:[%s1536_s5 + $0xe0] sm:$0xff] }
  0xa5   : > { %1083 = vmatmul.mubr.msk.f32.vlgmr.msra.gmra.mrb[0].mxu0 %vm294_vm1, %v293_v11 }
  0xa6   : > { %1093 = vmatpush3.bf16.msra.mxu0 %v1092_v23 }
  0xa7   : > { %1095 = vmatprep.subr.bf16.mxu0 %v1094_v24 }
  0xaa   : > { %1097 = vmatpush3.bf16.msra.mxu0 %v1096_v29 }
  0xab   : > { %1099 = vmatprep.subr.bf16.mxu0 %v1098_v30 }
  0xae   : > { %1101 = vmatpush3.bf16.msra.mxu0 %v1100_v35  ;;  %v712_v35 = vld [vmem:[%s1536_s5 + $0x88] sm:$0xff] }
  0xaf   : > { %1103 = vmatprep.subr.bf16.mxu0 %v1102_v36 }
  0xb2   : > { %1105 = vmatpush3.bf16.msra.mxu0 %v1104_v41  ;;  %v714_v41 = vld [vmem:[%s1536_s5 + $0x98] sm:$0xff] }
  0xb3   : > { %1107 = vmatprep.subr.bf16.mxu0 %v1106_v42  ;;  %v1126_v42 = vpack.c.bf16 %v714_v41, %v713_v40 }
  0xb6   : > { %1109 = vmatpush3.bf16.msra.mxu0 %v1108_v54  ;;  %v1134_v54 = vpack.c.bf16 %v718_v53, %v717_v52 }
  0xb7   : > { %1111 = vmatprep.subr.bf16.mxu0 %v1110_v57  ;;  %v1136_v57 = vpack.c.bf16 %v702_v56, %v701_v55 }
  0xba   : > { %1113 = vmatpush3.bf16.msra.mxu0 %v1112_v60  ;;  %v1138_v60 = vpack.c.bf16 %v720_v59, %v719_v58 }
  0xbb   : > { %1115 = vmatprep.subr.bf16.mxu0 %v1114_v63  ;;  %v1140_v63 = vpack.c.bf16 %v704_v62, %v703_v61 }
  0xbe   : > { %1117 = vmatpush3.bf16.msra.mxu0 %v1116_v5  ;;  %v705_v5 = vld [vmem:[%s1536_s5 + $0x50] sm:$0xff] }
  0xbf   : > { %1119 = vmatprep.subr.bf16.mxu0 %v1118_v12  ;;  %v1144_v12 = vpack.c.bf16 %v706_v9, %v705_v5 }
 0x178   : > { %v363_v13 = vpop.f32.mrb[0].mxu0 }
 0x179   : > { %v367_v14 = vmax.f32 %v363_v13, 0.0  ;;  %v1084_v15 = vpop.f32.mrb[1].mxu0  ;;  %v495_v13 = vld [vmem:[%s1534_s3 + $0x70] sm:$0xff] }
 0x17b   : > { %1088 = vmatmul.mubr.msk.f32.vlgmr.msra.gmra.mrb[0].mxu1 %vm369_vm3, %v367_v14  ;;  %v1120_v14 = vpack.c.bf16 %v496_v7, %v495_v13  ;;  %v707_v7 = vld [vmem:[%s1536_s5 + $0x60] sm:$0xff] }
 0x17c   : > { %660 = vmatprep.mubr.f32.mxu1 %v1214_v3 }
 0x17d   : > { %1121 = vmatpush3.bf16.msra.mxu0 %v1120_v14  ;;  %v708_v14 = vld [vmem:[%s1536_s5 + $0x68] sm:$0xff] }
 0x24e   : > { %v443_v43 = vpop.f32.mrb[0].mxu1 }
 0x24f   : > { %v986_v44 = vmul.f32 -1.442695, %v443_v43  ;;  %v1089_v45 = vpop.f32.mrb[1].mxu1  ;;  %v697_v43 = vld [vmem:[%s1536_s5 + $0x10] sm:$0xff] }
 0x251   : > { %1166 = vpow2.f32 %v986_v44  ;;  %v698_v44 = vld [vmem:[%s1536_s5 + $0x18] sm:$0xff] }
 0x252   : > { %v1128_v45 = vpack.c.bf16 %v698_v44, %v697_v43 }
 0x25b   : > { %v1167_v46 = vpop.eup %1166 }
 0x25c   : > { %v450_v47 = vadd.f32 1.0, %v1167_v46  ;;  %v715_v46 = vld [vmem:[%s1536_s5 + $0xa0] sm:$0xff] }
 0x25e   : > { %1168 = vrcp.f32 %v450_v47  ;;  %v716_v47 = vld [vmem:[%s1536_s5 + $0xa8] sm:$0xff] }
 0x268   : > { %v1169_v48 = vpop.eup %1168 }
 0x269   : > { %v987_v49 = vmul.f32 -1.442695, %v1169_v48  ;;  %v1130_v48 = vpack.c.bf16 %v716_v47, %v715_v46 }
 0x26b   : > { %1170 = vpow2.f32 %v987_v49  ;;  %v699_v49 = vld [vmem:[%s1536_s5 + $0x20] sm:$0xff] }
 0x275   : > { %v1171_v50 = vpop.eup %1170 }
 0x276   : > { %v456_v51 = vadd.f32 1.0, %v1171_v50  ;;  %v700_v50 = vld [vmem:[%s1536_s5 + $0x28] sm:$0xff] }
 0x278   : > { %1172 = vrcp.f32 %v456_v51  ;;  %v1132_v51 = vpack.c.bf16 %v700_v50, %v699_v49 }
 0x282   : > { %v1173_v8 = vpop.eup %1172 }
 0x283   : > { %v459_v11 = vadd.f32 1.0, %v1173_v8  ;;  %v1142_v8 = vpack.c.bf16 %v722_v4, %v721_v2 }
 0x285   : > { %v463_v15 = vrot.slane %v459_v11, %v1377_v6  ;;  %v724_v11 = vld [vmem:[%s1536_s5 + $0xe8] sm:$0xff] }
 0x286   : > { %v1146_v13 = vpack.c.bf16 %v724_v11, %v723_v10 }
 0x287   : > { %465 = vbcast.lane.b32.xlu0 %v463_v15, 256  ;;  %v725_v15 = vld [vmem:[%s1536_s5 + $0xf0] sm:$0xff] }
 0x2f9   : > { %v466_v16 = vpop.permute.xlu0 %465 }
 0x2fa   : > { %v1393_v17 = vmul.f32 %v466_v16, %v1272_v0  ;;  %v1396_v18 = vmul.f32 %v466_v16, %v1274_v1  ;;  %v584_v1 = vld [vmem:[%s1535_s4] sm:$0xff]  ;;  %v726_v16 = vld [vmem:[%s1536_s5 + $0xf8] sm:$0xff] }
 0x2fb   : > { %v586_v30 = vcombine.high %v584_v1, %v584_v1 }
 0x2fc   : > { %v469_v19 = vrot.slane %v1393_v17, 4  ;;  %v475_v20 = vrot.slane %v1396_v18, 4 }
 0x2fd   : > { %988 = vmatprep.subr.msk.mxu1 %vm591_vm4, %v586_v30 }
 0x2fe   : > { %v470_v21 = vadd.f32 %v469_v19, %v1393_v17  ;;  %v476_v22 = vadd.f32 %v475_v20, %v1396_v18  ;;  %989 = vmatpush1.msk.msra.mxu1 %vm591_vm4, %v584_v1  ;;  %v1148_v19 = vpack.c.bf16 %v708_v14, %v707_v7  ;;  %v1150_v20 = vpack.c.bf16 %v726_v16, %v725_v15 }
 0x300   : > { %v471_v23 = vrot.slane %v470_v21, 2  ;;  %v477_v24 = vrot.slane %v476_v22, 2 }
 0x302   : > { %v472_v25 = vadd.f32 %v471_v23, %v470_v21  ;;  %v478_v26 = vadd.f32 %v477_v24, %v476_v22  ;;  %v709_v21 = vld [vmem:[%s1536_s5 + $0x70] sm:$0xff]  ;;  %v710_v22 = vld [vmem:[%s1536_s5 + $0x78] sm:$0xff] }
 0x303   : > { %v1152_v23 = vpack.c.bf16 %v710_v22, %v709_v21 }
 0x304   : > { %v473_v27 = vrot.slane %v472_v25, 1  ;;  %v479_v28 = vrot.slane %v478_v26, 1 }
 0x306   : > { %v1402_v29 = vadd.f32 %v479_v28, %v478_v26  ;;  %v1404_v0 = vadd.f32 %v473_v27, %v472_v25 }
 0x308   : > { %577 = vmatprep.mubr.f32.mxu0 %v1402_v29 }
 0x309   : > { %578 = vmatmul.mubr.f32.vlgmr.msra.gmra.mrb[2].mxu0 %v1404_v0 }
 0x30a   : > { %872 = vmatprep.mubr.f32.mxu0 %v1214_v3  ;;  %v711_v3 = vld [vmem:[%s1536_s5 + $0x80] sm:$0xff] }
 0x30b   : > { %v1122_v36 = vpack.c.bf16 %v712_v35, %v711_v3 }
 0x30d   : > { %1123 = vmatprep.subr.bf16.mxu1 %v1122_v36 }
 0x3dc   : > { %v1042_v31 = vpop.f32.mrb[2].mxu0 }
 0x3dd   : > { %v1043_v32 = vpop.f32.mrb[3].mxu0 }
 0x3de   : > { %v1044_v33 = vadd.f32 %v1043_v32, %v1042_v31 }
 0x3e0   : > { %v583_v34 = vmax.f32 %v1044_v33, 0.0 }
 0x3e2   : > { %990 = vmatmul.mubr.msk.f32.vlgmr.msra.gmra.mrb[2].mxu1 %vm587_vm5, %v583_v34 }
 0x3e3   : > { %1125 = vmatpush3.bf16.msra.mxu1 %v1124_v39 }
 0x3e4   : > { %1127 = vmatprep.subr.bf16.mxu1 %v1126_v42 }
 0x3e7   : > { %1129 = vmatpush3.bf16.msra.mxu1 %v1128_v45  ;;  %v798_v45 = vld [vmem:[%s1537_s6] sm:$0xff] }
 0x3e8   : > { %1131 = vmatprep.subr.bf16.mxu1 %v1130_v48  ;;  %v800_v46 = vcombine.high %v798_v45, %v798_v45 }
 0x3ea   : > { %995 = vmatprep.subr.msk.mxu0 %vm591_vm4, %v800_v46 }
 0x3eb   : > { %1133 = vmatpush3.bf16.msra.mxu1 %v1132_v51  ;;  %996 = vmatpush1.msk.msra.mxu0 %vm591_vm4, %v798_v45 }
 0x3ec   : > { %1135 = vmatprep.subr.bf16.mxu1 %v1134_v54 }
 0x3ef   : > { %1137 = vmatpush3.bf16.msra.mxu1 %v1136_v57 }
 0x3f0   : > { %1139 = vmatprep.subr.bf16.mxu1 %v1138_v60 }
 0x3f3   : > { %1141 = vmatpush3.bf16.msra.mxu1 %v1140_v63 }
 0x3f4   : > { %1143 = vmatprep.subr.bf16.mxu1 %v1142_v8 }
 0x3f7   : > { %1145 = vmatpush3.bf16.msra.mxu1 %v1144_v12 }
 0x3f8   : > { %1147 = vmatprep.subr.bf16.mxu1 %v1146_v13 }
 0x3fb   : > { %1149 = vmatpush3.bf16.msra.mxu1 %v1148_v19 }
 0x3fc   : > { %1151 = vmatprep.subr.bf16.mxu1 %v1150_v20 }
 0x3ff   : > { %1153 = vmatpush3.bf16.msra.mxu1 %v1152_v23 }
 0x4b5   : > { %v662_v24 = vpop.f32.mrb[2].mxu1 }
 0x4b6   : > { %v991_v25 = vmul.f32 -1.442695, %v662_v24  ;;  %v664_v26 = vpop.f32.mrb[3].mxu1 }
 0x4b7   : > { %v992_v27 = vmul.f32 -1.442695, %v664_v26 }
 0x4b8   : > { %1174 = vpow2.f32 %v991_v25 }
 0x4b9   : > { %1176 = vpow2.f32 %v992_v27 }
 0x4c2   : > { %v1175_v28 = vpop.eup %1174 }
 0x4c3   : > { %v1177_v1 = vpop.eup %1176  ;;  %v673_v30 = vadd.f32 1.0, %v1175_v28 }
 0x4c4   : > { %v674_v31 = vadd.f32 1.0, %v1177_v1 }
 0x4c5   : > { %1178 = vrcp.f32 %v673_v30 }
 0x4c6   : > { %1180 = vrcp.f32 %v674_v31 }
 0x4cf   : > { %v1179_v32 = vpop.eup %1178 }
 0x4d0   : > { %v1181_v33 = vpop.eup %1180  ;;  %v993_v34 = vmul.f32 -1.442695, %v1179_v32 }
 0x4d1   : > { %v994_v3 = vmul.f32 -1.442695, %v1181_v33 }
 0x4d2   : > { %1182 = vpow2.f32 %v993_v34 }
 0x4d3   : > { %1184 = vpow2.f32 %v994_v3 }
 0x4dc   : > { %v1183_v35 = vpop.eup %1182 }
 0x4dd   : > { %v1185_v36 = vpop.eup %1184  ;;  %v685_v37 = vadd.f32 1.0, %v1183_v35 }
 0x4de   : > { %v686_v38 = vadd.f32 1.0, %v1185_v36 }
 0x4df   : > { %1186 = vrcp.f32 %v685_v37 }
 0x4e0   : > { %1188 = vrcp.f32 %v686_v38 }
 0x4e9   : > { %v1187_v39 = vpop.eup %1186 }
 0x4ea   : > { %v1189_v40 = vpop.eup %1188  ;;  %v691_v41 = vadd.f32 1.0, %v1187_v39 }
 0x4eb   : > { %v692_v42 = vadd.f32 1.0, %v1189_v40 }
 0x4ec   : > { %v693_v44 = vmul.f32 %v691_v41, %v1404_v0 }
 0x4ed   : > { %v694_v43 = vmul.f32 %v692_v42, %v1402_v29 }
 0x4ef   : > { %791 = vmatprep.mubr.f32.mxu1 %v694_v43 }
 0x4f0   : > { %792 = vmatmul.mubr.f32.vlgmr.msra.gmra.mrb[4].mxu1 %v693_v44 }
 0x5c3   : > { %v1077_v47 = vpop.f32.mrb[4].mxu1 }
 0x5c4   : > { %v1078_v48 = vpop.f32.mrb[5].mxu1 }
 0x5c5   : > { %v1079_v49 = vadd.f32 %v1078_v48, %v1077_v47 }
 0x5c7   : > { %v797_v50 = vmax.f32 %v1079_v49, 0.0 }
 0x5c9   : > { %997 = vmatmul.mubr.msk.f32.vlgmr.msra.gmra.mrb[4].mxu0 %vm587_vm5, %v797_v50 }
 0x69c   : > { %v874_v29 = vpop.f32.mrb[4].mxu0 }
 0x69d   : > { %v998_v51 = vmul.f32 -1.442695, %v874_v29  ;;  %v876_v0 = vpop.f32.mrb[5].mxu0 }
 0x69e   : > { %v999_v52 = vmul.f32 -1.442695, %v876_v0 }
 0x69f   : > { %1190 = vpow2.f32 %v998_v51 }
 0x6a0   : > { %1192 = vpow2.f32 %v999_v52 }
 0x6a9   : > { %v1191_v53 = vpop.eup %1190 }
 0x6aa   : > { %v1193_v54 = vpop.eup %1192  ;;  %v885_v55 = vadd.f32 1.0, %v1191_v53 }
 0x6ab   : > { %v886_v56 = vadd.f32 1.0, %v1193_v54 }
 0x6ac   : > { %1194 = vrcp.f32 %v885_v55 }
 0x6ad   : > { %1196 = vrcp.f32 %v886_v56 }
 0x6b6   : > { %v1195_v57 = vpop.eup %1194 }
 0x6b7   : > { %v1197_v58 = vpop.eup %1196  ;;  %v1000_v59 = vmul.f32 -1.442695, %v1195_v57 }
 0x6b8   : > { %v1001_v60 = vmul.f32 -1.442695, %v1197_v58 }
 0x6b9   : > { %1198 = vpow2.f32 %v1000_v59 }
 0x6ba   : > { %1200 = vpow2.f32 %v1001_v60 }
 0x6c3   : > { %v1199_v61 = vpop.eup %1198 }
 0x6c4   : > { %v1201_v62 = vpop.eup %1200  ;;  %v897_v63 = vadd.f32 1.0, %v1199_v61 }
 0x6c5   : > { %v898_v2 = vadd.f32 1.0, %v1201_v62 }
 0x6c6   : > { %1202 = vrcp.f32 %v897_v63 }
 0x6c7   : > { %1204 = vrcp.f32 %v898_v2 }
 0x6d0   : > { %v1203_v4 = vpop.eup %1202 }
 0x6d1   : > { %v1205_v5 = vpop.eup %1204  ;;  %v903_v8 = vadd.f32 1.0, %v1203_v4 }
 0x6d2   : > { %v904_v9 = vadd.f32 1.0, %v1205_v5 }
 0x6d3   : > { %v905_v10 = vmul.f32 %v903_v8, %v691_v41 }
 0x6d4   : > { %v906_v11 = vmul.f32 %v904_v9, %v692_v42 }
 0x6d5   : > { %v910_v12 = vrot.slane %v905_v10, %v1377_v6 }
 0x6d6   : > { %v914_v13 = vrot.slane %v906_v11, %v1377_v6 }
 0x6d7   : > { %v915_v7 = vmul.f32 %v910_v12, %v1393_v17 }
 0x6d8   : > { %v916_v14 = vmul.f32 %v914_v13, %v1396_v18 }
 0x6d9   : > { %917 = vst [vmem:[%s278_s28] sm:$0xff] %v915_v7 }
 0x6da   : > { %918 = vst [vmem:[%s278_s28 + $0x8] sm:$0xff] %v916_v14 }
 0x6db PF: > { %s17_s24 = sadd.s32 1, %s1212_s24  }
 0x6dc   : > { %p14_p4 = scmp.ge.s32.totalorder %s17_s24, 4  }
 0x6de   :  { %16 = sbr.rel (!%p14_p4) target bundleno = 1 (0x1), region = 78 }

</bundles_post_ra>
